<compile_context>
chip_gen: v7x
topology: tpu7x:2x2x1
jax: 0.10.0
libtpu: 0.0.40
codegen_flags: <defaults>
</compile_context>

<pallas_src>
import random

import numpy as np
import jax
import jax.numpy as jnp
from jax.experimental import pallas as pl
from jax.experimental.pallas import tpu as pltpu


def _round_up(x, m):
    return ((x + m - 1) // m) * m


def _default_tm():
    # 256 fills the 256x256 MXU on v6e/v7x; v5e MXUs are natively 128x128.
    try:
        kind = jax.devices()[0].device_kind.lower()
        if "v5 lite" in kind or "v5e" in kind or "v5litepod" in kind:
            return 128
    except Exception:
        pass
    return 256


# ---------------------------------------------------------------------------
# Kernels
# ---------------------------------------------------------------------------
def _mean_agg_resident_kernel(mask_ref, emb_ref, inv_ref, out_ref):
    # One MXU dot per row tile; the emb block index is constant, so the table
    # stays resident in VMEM across the whole grid.
    acc = jnp.dot(mask_ref[...], emb_ref[...],
                  preferred_element_type=jnp.float32)
    out_ref[...] = (acc * inv_ref[...]).astype(out_ref.dtype)


def _mean_agg_tiled_kernel(mask_ref, emb_ref, inv_ref, out_ref):
    # Fallback when emb does not fit in VMEM: reduce over U tiles, accumulate
    # directly into the resident f32 output block (no acc scratch).
    k = pl.program_id(1)

    @pl.when(k == 0)
    def _():
        out_ref[...] = jnp.zeros_like(out_ref)

    out_ref[...] += jnp.dot(mask_ref[...], emb_ref[...],
                            preferred_element_type=jnp.float32)

    @pl.when(k == pl.num_programs(1) - 1)
    def _():
        out_ref[...] *= inv_ref[...]


# Safe under v7x's 32 MiB scoped-VMEM default (64 MiB physical); far below the
# 128 MiB on v5e/v6e.
_RESIDENT_VMEM_BUDGET = 24 * 1024 * 1024


def mean_aggregate(mask, emb, inv_cnt, *, tm=None, tk=2048):
    """mask: [B, U] bf16 binary, emb: [U, D] bf16, inv_cnt: [B, 1] f32
    (precomputed 1/max(num_neighbors, 1)).  Returns [B, D] f32 row means.

    B must be a multiple of tm, U a multiple of 128, D a multiple of 128
    (256 preferred on v6e/v7x).  Caller pads with zeros; zero-padded rows
    yield zero output because their mask rows are all-zero and inv_cnt is a
    guarded reciprocal.
    """
    B, U = mask.shape
    U2, D = emb.shape
    assert U == U2 and inv_cnt.shape == (B, 1)
    if tm is None:
        tm = _default_tm()
    tm = min(tm, B)
    assert B % tm == 0 and U % 128 == 0 and D % 128 == 0

    # Conservative VMEM estimate for the resident path (count double buffers).
    resident_bytes = (2 * U * D * 2        # emb, bf16
                      + 2 * tm * U * 2     # mask row tile, bf16
                      + 2 * tm * D * 4     # out tile, f32
                      + 2 * tm * 4)        # inv tile, f32
    if resident_bytes <= _RESIDENT_VMEM_BUDGET:
        return pl.pallas_call(
            _mean_agg_resident_kernel,
            out_shape=jax.ShapeDtypeStruct((B, D), jnp.float32),
            grid_spec=pltpu.PrefetchScalarGridSpec(
                num_scalar_prefetch=0,
                grid=(B // tm,),
                in_specs=[
                    pl.BlockSpec((tm, U), lambda i: (i, 0)),   # mask row tile
                    pl.BlockSpec((U, D), lambda i: (0, 0)),    # resident emb
                    pl.BlockSpec((tm, 1), lambda i: (i, 0)),   # 1/count
                ],
                out_specs=pl.BlockSpec((tm, D), lambda i: (i, 0)),
            ),
            compiler_params=pltpu.CompilerParams(
                dimension_semantics=("parallel",)),
        )(mask, emb, inv_cnt)

    # Fallback: tile the U reduction.  Pick the largest tk (<= requested) that
    # divides U; U is a multiple of 128, so tk=128 always terminates the loop.
    tk = min(tk, U)
    while U % tk != 0 or tk % 128 != 0:
        tk -= 128
    assert tk >= 128
    return pl.pallas_call(
        _mean_agg_tiled_kernel,
        out_shape=jax.ShapeDtypeStruct((B, D), jnp.float32),
        grid_spec=pltpu.PrefetchScalarGridSpec(
            num_scalar_prefetch=0,
            grid=(B // tm, U // tk),
            in_specs=[
                pl.BlockSpec((tm, tk), lambda i, k: (i, k)),   # mask tile
                pl.BlockSpec((tk, D), lambda i, k: (k, 0)),    # emb tile
                pl.BlockSpec((tm, 1), lambda i, k: (i, 0)),    # 1/count
            ],
            out_specs=pl.BlockSpec((tm, D), lambda i, k: (i, 0)),
        ),
        compiler_params=pltpu.CompilerParams(
            dimension_semantics=("parallel", "arbitrary")),
    )(mask, emb, inv_cnt)


# ---------------------------------------------------------------------------
# Host glue mirroring MeanAggregator.forward (gcn=False, cuda=False)
# ---------------------------------------------------------------------------
def mean_aggregator_forward(nodes, to_neighs, feature_table, num_sample=10):
    _set = set
    if num_sample is not None:
        _sample = random.sample
        samp_neighs = [
            _set(_sample(sorted(to_neigh), num_sample))
            if len(to_neigh) >= num_sample else to_neigh
            for to_neigh in to_neighs
        ]
    else:
        samp_neighs = to_neighs

    unique_nodes_list = sorted(set.union(*samp_neighs))
    unique_nodes = {n: i for i, n in enumerate(unique_nodes_list)}

    B = len(samp_neighs)
    U_real = len(unique_nodes_list)
    D_real = feature_table.shape[1]

    # Padding:
    #   B -> multiple of the MXU row tile tm (256 on v6e/v7x, 128 on v5e),
    #   U -> multiple of 128 (mask lane dim / emb sublane dim),
    #   D -> multiple of 256 so the MXU result width is full on v6e/v7x and
    #        the output store stays lane-dense.
    tm = _default_tm()
    B_pad = max(tm, _round_up(B, tm))
    U_pad = max(128, _round_up(U_real, 128))
    D_pad = max(256, _round_up(D_real, 256))

    # Binary mask via one vectorized scatter (no Python double loop on write).
    row_idx = np.fromiter(
        (i for i, sn in enumerate(samp_neighs) for _ in sn), dtype=np.int32)
    col_idx = np.fromiter(
        (unique_nodes[n] for sn in samp_neighs for n in sn), dtype=np.int32)
    mask = jnp.zeros((B_pad, U_pad), dtype=jnp.bfloat16)
    mask = mask.at[jnp.asarray(row_idx), jnp.asarray(col_idx)].set(
        jnp.bfloat16(1.0))

    # Exact reciprocal neighbor counts, computed once on the host (replaces the
    # per-step in-kernel count reduction).  Zero-padded rows get inv=1.0 but
    # produce 0 output because their mask rows are all-zero (the PyTorch 0/0
    # NaN path is intentionally replaced with 0 for padding rows).
    cnt = np.bincount(row_idx, minlength=B_pad).astype(np.float32)
    inv_cnt = jnp.asarray((1.0 / np.maximum(cnt, 1.0)).reshape(B_pad, 1),
                          dtype=jnp.float32)

    # "features" == embedding-table lookup, done on-device with jnp.take;
    # feature table padded once along D, unique rows padded along U.
    ft = jnp.pad(feature_table, ((0, 0), (0, D_pad - D_real)))
    emb = jnp.take(ft, jnp.asarray(unique_nodes_list, dtype=jnp.int32), axis=0)
    emb = jnp.pad(emb, ((0, U_pad - U_real), (0, 0))).astype(jnp.bfloat16)

    out = mean_aggregate(mask, emb, inv_cnt, tm=tm)   # [B_pad, D_pad] f32
    return out[:B, :D_real], mask, emb, inv_cnt


if __name__ == "__main__":
    random.seed(0)
    np.random.seed(0)

    num_graph_nodes = 64
    feat_dim = 32
    batch = 8
    num_sample = 5

    # Deterministic synthetic feature table (the `features` callable's weights).
    key = jax.random.PRNGKey(0)
    feature_table = jax.random.normal(
        key, (num_graph_nodes, feat_dim), dtype=jnp.float32)

    # Deterministic synthetic graph: each node gets 6-10 random neighbors.
    to_neighs_all = []
    for n in range(num_graph_nodes):
        k = random.randint(6, 10)
        neighs = set(random.sample(range(num_graph_nodes), k))
        neighs.discard(n)
        if not neighs:
            neighs = {(n + 1) % num_graph_nodes}
        to_neighs_all.append(neighs)

    nodes = list(range(batch))
    to_neighs = [to_neighs_all[n] for n in nodes]

    out, mask_dev, emb_dev, inv_dev = mean_aggregator_forward(
        nodes, to_neighs, feature_table, num_sample=num_sample)
    out = jax.block_until_ready(out)

    # Reference check (same operands the kernel saw: binary mask, bf16 emb,
    # exact host-side reciprocal counts).
    mask_np = np.asarray(mask_dev.astype(jnp.float32))
    emb_np = np.asarray(emb_dev.astype(jnp.float32))
    inv_np = np.asarray(inv_dev)
    ref = (mask_np @ emb_np) * inv_np
    ref = ref[:batch, :feat_dim]
    np.testing.assert_allclose(np.asarray(out), ref, rtol=1e-2, atol=1e-2)

    print("KERNEL_OK")
</pallas_src>

<mosaic_0001>
module attributes {stable_mosaic.version = 11 : i64} {
  func.func @_mean_agg_resident_kernel(%arg0: i32, %arg1: memref<256x128xbf16, #tpu.memory_space<vmem>>, %arg2: memref<128x256xbf16, #tpu.memory_space<vmem>>, %arg3: memref<256x1xf32, #tpu.memory_space<vmem>>, %arg4: memref<256x256xf32, #tpu.memory_space<vmem>>) attributes {dimension_semantics = [#tpu.dimension_semantics<parallel>], iteration_bounds = array<i64: 1>, scalar_prefetch = 0 : i64, scratch_operands = 0 : i64, tpu.core_type = #tpu.core_type<tc>, window_params = [{transform_indices = @transform_0, window_bounds = array<i64: 256, 128>}, {pipeline_mode = #tpu.pipeline_mode<synchronous>, transform_indices = @transform_1, window_bounds = array<i64: 128, 256>}, {transform_indices = @transform_2, window_bounds = array<i64: 256, 1>}, {transform_indices = @transform_3, window_bounds = array<i64: 256, 256>}]} {
    %c0 = arith.constant 0 : index
    %c0_0 = arith.constant 0 : index
    %0 = vector.load %arg1[%c0, %c0_0] : memref<256x128xbf16, #tpu.memory_space<vmem>>, vector<256x128xbf16>
    %c0_1 = arith.constant 0 : index
    %c0_2 = arith.constant 0 : index
    %1 = vector.load %arg2[%c0_1, %c0_2] : memref<128x256xbf16, #tpu.memory_space<vmem>>, vector<128x256xbf16>
    %cst = arith.constant dense<0.000000e+00> : vector<256x256xf32>
    %2 = tpu.matmul %0, %1, %cst {dimension_numbers = #tpu.dot_dimension_numbers<[1], [0], [0], [1], [0, 0, 1, 1], [], []>} : vector<256x128xbf16>, vector<128x256xbf16>, vector<256x256xf32> -> vector<256x256xf32>
    %c0_3 = arith.constant 0 : index
    %c0_4 = arith.constant 0 : index
    %3 = vector.load %arg3[%c0_3, %c0_4] : memref<256x1xf32, #tpu.memory_space<vmem>>, vector<256x1xf32>
    %4 = vector.broadcast %3 : vector<256x1xf32> to vector<256x256xf32>
    %5 = arith.mulf %2, %4 : vector<256x256xf32>
    %c0_5 = arith.constant 0 : index
    %c0_6 = arith.constant 0 : index
    %6 = vector.load %arg4[%c0_5, %c0_6] : memref<256x256xf32, #tpu.memory_space<vmem>>, vector<256x256xf32>
    tpu.vector_store %arg4[%c0_5, %c0_6], %5 {strides = array<i32>} : memref<256x256xf32, #tpu.memory_space<vmem>>, vector<256x256xf32>,
    return
  }
  func.func @transform_0(%arg0: i32) -> (i32, i32) {
    %c0_i32 = arith.constant 0 : i32
    %c0_i32_0 = arith.constant 0 : i32
    return %arg0, %c0_i32 : i32, i32
  }
  func.func @transform_1(%arg0: i32) -> (i32, i32) {
    %c0_i32 = arith.constant 0 : i32
    %c0_i32_0 = arith.constant 0 : i32
    %c0_i32_1 = arith.constant 0 : i32
    return %c0_i32, %c0_i32_0 : i32, i32
  }
  func.func @transform_2(%arg0: i32) -> (i32, i32) {
    %c0_i32 = arith.constant 0 : i32
    %c0_i32_0 = arith.constant 0 : i32
    return %arg0, %c0_i32 : i32, i32
  }
  func.func @transform_3(%arg0: i32) -> (i32, i32) {
    %c0_i32 = arith.constant 0 : i32
    %c0_i32_0 = arith.constant 0 : i32
    return %arg0, %c0_i32 : i32, i32
  }
}

</mosaic_0001>

<bundles_post_ra>
// kernel: tpu_custom_call.1
= control target key start
LH: loop header
LB: loop body
LE: loop exit
PB: predicated region body
PF: predicated region fallthrough
CT: control target
= control target key end

     0   :  { %v887_v2 = vmov 0   ;;  %s1181_s0 = inlined_call_operand.vmem [shape: bf16[256,128], index: 0, kind: input, shape index: {}]   ;;  %s1182_s1 = inlined_call_operand.vmem [shape: bf16[128,256], index: 1, kind: input, shape index: {}]   ;;  %s1183_s2 = inlined_call_operand.vmem [shape: f32[256,1], index: 2, kind: input, shape index: {}]   ;;  %s1184_s3 = inlined_call_operand.hbm [shape: f32[256,256], index: 3, kind: output, shape index: {}]  }
   0x1   :  { %v823_v0 = vld [vmem:[%s1182_s1 + $0x4] ss:$8 sps:$4 sm:$0xff]   ;;  %v825_v1 = vld [vmem:[%s1182_s1] ss:$8 sps:$4 sm:$0xff]   ;;  %272 = vmatprep.mubr.bf16.mxu0 %v887_v2  ;;  %352 = vmatprep.mubr.bf16.mxu1 %v887_v2  ;;  %v826_v3 = vld [vmem:[%s1182_s1 + $0x14] ss:$8 sps:$4 sm:$0xff]  }
   0x2   :  { %240 = vmatprep.subr.bf16.mxu0 %v823_v0  ;;  %801 = vmatprep.subr.bf16.mxu1 %v823_v0  ;;  %v828_v4 = vld [vmem:[%s1182_s1 + $0x10] ss:$8 sps:$4 sm:$0xff]   ;;  %v829_v5 = vld [vmem:[%s1182_s1 + $0x24] ss:$8 sps:$4 sm:$0xff]   ;;  %v831_v6 = vld [vmem:[%s1182_s1 + $0x20] ss:$8 sps:$4 sm:$0xff]  }
   0x3   :  { %241 = vmatpush1.bf16.msra.mxu0 %v825_v1  ;;  %809 = vmatpush1.bf16.msra.mxu1 %v825_v1  ;;  %v832_v7 = vld [vmem:[%s1182_s1 + $0x34] ss:$8 sps:$4 sm:$0xff]   ;;  %v834_v8 = vld [vmem:[%s1182_s1 + $0x30] ss:$8 sps:$4 sm:$0xff]   ;;  %v835_v9 = vld [vmem:[%s1182_s1 + $0x44] ss:$8 sps:$4 sm:$0xff]  }
   0x4   :  { %242 = vmatprep.subr.bf16.mxu0 %v826_v3  ;;  %802 = vmatprep.subr.bf16.mxu1 %v826_v3  ;;  %v837_v10 = vld [vmem:[%s1182_s1 + $0x40] ss:$8 sps:$4 sm:$0xff]   ;;  %v838_v11 = vld [vmem:[%s1182_s1 + $0x54] ss:$8 sps:$4 sm:$0xff]   ;;  %v840_v14 = vld [vmem:[%s1182_s1 + $0x50] ss:$8 sps:$4 sm:$0xff]  }
   0x5   :  { %822 = vset.pattern.permute.xlu1 %v887_v2  ;;  %821 = vset.pattern.permute.xlu0 %v887_v2  ;;  %v435_v12 = vld [vmem:[%s1183_s2 + $0x10] sm:$0xff]  ;;  %v433_v13 = vld [vmem:[%s1183_s2] sm:$0xff]  ;;  %v436_v15 = vld [vmem:[%s1183_s2 + $0x18] sm:$0xff] }
   0x6   :  { %477 = vperm.xlu1 %822, %v435_v12   ;;  %467 = vperm.xlu0 %821, %v433_v13   ;;  %v434_v16 = vld [vmem:[%s1183_s2 + $0x8] sm:$0xff]  ;;  %v437_v20 = vld [vmem:[%s1183_s2 + $0x20] sm:$0xff]  ;;  %v844_v21 = vld [vmem:[%s1182_s1 + $0x74] ss:$8 sps:$4 sm:$0xff]  }
   0x7   :  { %243 = vmatpush1.bf16.msra.mxu0 %v828_v4  ;;  %810 = vmatpush1.bf16.msra.mxu1 %v828_v4  ;;  %v841_v17 = vld [vmem:[%s1182_s1 + $0x64] ss:$8 sps:$4 sm:$0xff]   ;;  %v843_v19 = vld [vmem:[%s1182_s1 + $0x60] ss:$8 sps:$4 sm:$0xff]   ;;  %v846_v22 = vld [vmem:[%s1182_s1 + $0x70] ss:$8 sps:$4 sm:$0xff]  }
   0x8   :  { %244 = vmatprep.subr.bf16.mxu0 %v829_v5  ;;  %803 = vmatprep.subr.bf16.mxu1 %v829_v5  ;;  %v438_v18 = vld [vmem:[%s1183_s2 + $0x28] sm:$0xff]  ;;  %v440_v23 = vld [vmem:[%s1183_s2 + $0x38] sm:$0xff]  ;;  %v439_v24 = vld [vmem:[%s1183_s2 + $0x30] sm:$0xff] }
   0x9   :  { %v847_v25 = vld [vmem:[%s1181_s0] sm:$0xff]   ;;  %v442_v27 = vld [vmem:[%s1183_s2 + $0x48] sm:$0xff]  ;;  %v444_v29 = vld [vmem:[%s1183_s2 + $0x58] sm:$0xff] }
   0xa   :  { %482 = vperm.xlu1 %822, %v436_v15   ;;  %472 = vperm.xlu0 %821, %v434_v16   ;;  %v848_v26 = vld [vmem:[%s1181_s0 + $0x40] sm:$0xff]   ;;  %v443_v30 = vld [vmem:[%s1183_s2 + $0x50] sm:$0xff] }
   0xb   :  { %245 = vmatpush1.bf16.msra.mxu0 %v831_v6  ;;  %811 = vmatpush1.bf16.msra.mxu1 %v831_v6  ;;  %v441_v28 = vld [vmem:[%s1183_s2 + $0x40] sm:$0xff] }
   0xc   :  { %246 = vmatprep.subr.bf16.mxu0 %v832_v7  ;;  %804 = vmatprep.subr.bf16.mxu1 %v832_v7 }
   0xe   :  { %492 = vperm.xlu1 %822, %v438_v18   ;;  %487 = vperm.xlu0 %821, %v437_v20  }
   0xf   :  { %247 = vmatpush1.bf16.msra.mxu0 %v834_v8  ;;  %812 = vmatpush1.bf16.msra.mxu1 %v834_v8 }
  0x10   :  { %248 = vmatprep.subr.bf16.mxu0 %v835_v9  ;;  %805 = vmatprep.subr.bf16.mxu1 %v835_v9 }
  0x12   :  { %502 = vperm.xlu1 %822, %v440_v23   ;;  %497 = vperm.xlu0 %821, %v439_v24  }
  0x13   :  { %249 = vmatpush1.bf16.msra.mxu0 %v837_v10  ;;  %813 = vmatpush1.bf16.msra.mxu1 %v837_v10 }
  0x14   :  { %250 = vmatprep.subr.bf16.mxu0 %v838_v11  ;;  %806 = vmatprep.subr.bf16.mxu1 %v838_v11 }
  0x16   :  { %512 = vperm.xlu1 %822, %v442_v27   ;;  %507 = vperm.xlu0 %821, %v441_v28  }
  0x17   :  { %251 = vmatpush1.bf16.msra.mxu0 %v840_v14  ;;  %814 = vmatpush1.bf16.msra.mxu1 %v840_v14 }
  0x18   :  { %252 = vmatprep.subr.bf16.mxu0 %v841_v17  ;;  %807 = vmatprep.subr.bf16.mxu1 %v841_v17 }
  0x1a   :  { %522 = vperm.xlu1 %822, %v444_v29  }
  0x1b   :  { %253 = vmatpush1.bf16.msra.mxu0 %v843_v19  ;;  %815 = vmatpush1.bf16.msra.mxu1 %v843_v19 }
  0x1c   :  { %254 = vmatprep.subr.bf16.mxu0 %v844_v21  ;;  %808 = vmatprep.subr.bf16.mxu1 %v844_v21 }
  0x1f   :  { %255 = vmatpush1.bf16.msra.mxu0 %v846_v22  ;;  %816 = vmatpush1.bf16.msra.mxu1 %v846_v22 }
  0x22   :  { %273 = vmatmul.mubr.bf16.vlgmr.msra.gmra.mrb[0].mxu0 %v847_v25  ;;  %353 = vmatmul.mubr.bf16.vlgmr.msra.gmra.mrb[0].mxu1 %v848_v26 }
  0x23   :  { %282 = vmatprep.mubr.bf16.mxu0 %v887_v2  ;;  %362 = vmatprep.mubr.bf16.mxu1 %v887_v2 }
  0x24   :  { %8 = vsyncpa [#allocation3], 0  ;;  %v849_v31 = vld [vmem:[%s1181_s0 + $0x8] sm:$0xff]   ;;  %517 = vperm.xlu0 %821, %v443_v30   ;;  %v445_v34 = vld [vmem:[%s1183_s2 + $0x60] sm:$0xff] }
  0x25   :  { %v850_v32 = vld [vmem:[%s1181_s0 + $0x48] sm:$0xff]   ;;  %v448_v35 = vld [vmem:[%s1183_s2 + $0x78] sm:$0xff]  ;;  %v447_v36 = vld [vmem:[%s1183_s2 + $0x70] sm:$0xff] }
  0x26   :  { %v446_v33 = vld [vmem:[%s1183_s2 + $0x68] sm:$0xff]  ;;  %v851_v37 = vld [vmem:[%s1181_s0 + $0x10] sm:$0xff]   ;;  %v449_v40 = vld [vmem:[%s1183_s2 + $0x80] sm:$0xff] }
  0x27   :  { %532 = vperm.xlu1 %822, %v446_v33   ;;  %v852_v38 = vld [vmem:[%s1181_s0 + $0x50] sm:$0xff]   ;;  %v450_v39 = vld [vmem:[%s1183_s2 + $0x88] sm:$0xff]  ;;  %v452_v41 = vld [vmem:[%s1183_s2 + $0x98] sm:$0xff] }
  0x28   :  { %527 = vperm.xlu0 %821, %v445_v34   ;;  %v451_v42 = vld [vmem:[%s1183_s2 + $0x90] sm:$0xff]  ;;  %v853_v43 = vld [vmem:[%s1181_s0 + $0x18] sm:$0xff]   ;;  %v454_v45 = vld [vmem:[%s1183_s2 + $0xa8] sm:$0xff] }
  0x29   :  { %v854_v44 = vld [vmem:[%s1181_s0 + $0x58] sm:$0xff]   ;;  %v453_v46 = vld [vmem:[%s1183_s2 + $0xa0] sm:$0xff]  ;;  %v455_v48 = vld [vmem:[%s1183_s2 + $0xb0] sm:$0xff] }
  0x2a   :  { %283 = vmatmul.mubr.bf16.gmra.mrb[4].mxu0 %v849_v31  ;;  %363 = vmatmul.mubr.bf16.gmra.mrb[4].mxu1 %v850_v32  ;;  %v456_v47 = vld [vmem:[%s1183_s2 + $0xb8] sm:$0xff]  ;;  %v855_v49 = vld [vmem:[%s1181_s0 + $0x20] sm:$0xff]   ;;  %v458_v51 = vld [vmem:[%s1183_s2 + $0xc8] sm:$0xff] }
  0x2b   :  { %292 = vmatprep.mubr.bf16.mxu0 %v887_v2  ;;  %372 = vmatprep.mubr.bf16.mxu1 %v887_v2  ;;  %v856_v50 = vld [vmem:[%s1181_s0 + $0x60] sm:$0xff]   ;;  %v460_v53 = vld [vmem:[%s1183_s2 + $0xd8] sm:$0xff]  ;;  %v459_v54 = vld [vmem:[%s1183_s2 + $0xd0] sm:$0xff] }
  0x2c   :  { %542 = vperm.xlu1 %822, %v448_v35   ;;  %537 = vperm.xlu0 %821, %v447_v36   ;;  %v457_v52 = vld [vmem:[%s1183_s2 + $0xc0] sm:$0xff]  ;;  %v857_v55 = vld [vmem:[%s1181_s0 + $0x28] sm:$0xff]   ;;  %v464_v59 = vld [vmem:[%s1183_s2 + $0xf8] sm:$0xff] }
  0x2d   :  { %v858_v56 = vld [vmem:[%s1181_s0 + $0x68] sm:$0xff]   ;;  %v461_v58 = vld [vmem:[%s1183_s2 + $0xe0] sm:$0xff]  ;;  %v463_v60 = vld [vmem:[%s1183_s2 + $0xf0] sm:$0xff] }
  0x2e   :  { %v462_v57 = vld [vmem:[%s1183_s2 + $0xe8] sm:$0xff]  ;;  %v859_v61 = vld [vmem:[%s1181_s0 + $0x30] sm:$0xff]   ;;  %v861_v63 = vld [vmem:[%s1181_s0 + $0x38] sm:$0xff]  }
  0x2f   :  { %v860_v62 = vld [vmem:[%s1181_s0 + $0x70] sm:$0xff]   ;;  %v862_v0 = vld [vmem:[%s1181_s0 + $0x78] sm:$0xff]   ;;  %s888_s0 = smov [#allocation2]  }
  0x30   :  { %552 = vperm.xlu1 %822, %v450_v39   ;;  %547 = vperm.xlu0 %821, %v449_v40   ;;  %s758_s28 = sshll.u32 %s888_s0, 4  ;;  %s759_s28 = int_to_ptr.vmem [resolvable:$true] %s758_s28 }
  0x31   :  { %s863_s29 = scalar_lea.vmem %s759_s28, 8192  ;;  %p868_p1 = scmp.lt.s32.totalorder %s759_s28, %s759_s28 }
  0x32   :  { %293 = vmatmul.mubr.bf16.gmra.mrb[8].mxu0 %v851_v37  ;;  %373 = vmatmul.mubr.bf16.gmra.mrb[8].mxu1 %v852_v38  ;;  %p864_p0 = scmp.ne.s32.totalorder %s759_s28, %s863_s29  ;;  %p869_p2 = scmp.lt.s32.totalorder %s863_s29, %s863_s29 }
  0x33   :  { %302 = vmatprep.mubr.bf16.mxu0 %v887_v2  ;;  %382 = vmatprep.mubr.bf16.mxu1 %v887_v2 }
  0x34   :  { %562 = vperm.xlu1 %822, %v452_v41   ;;  %557 = vperm.xlu0 %821, %v451_v42   ;;  %p870_p3 = por %p869_p2, %p868_p1 }
  0x36   :  { %p871_p4 = pnand %p870_p3, %p864_p0 }
  0x38   :  { %572 = vperm.xlu1 %822, %v454_v45   ;;  %567 = vperm.xlu0 %821, %v453_v46  }
  0x3a   :  { %303 = vmatmul.mubr.bf16.gmra.mrb[12].mxu0 %v853_v43  ;;  %383 = vmatmul.mubr.bf16.gmra.mrb[12].mxu1 %v854_v44 }
  0x3b   :  { %312 = vmatprep.mubr.bf16.mxu0 %v887_v2  ;;  %392 = vmatprep.mubr.bf16.mxu1 %v887_v2 }
  0x3c   :  { %582 = vperm.xlu1 %822, %v456_v47   ;;  %577 = vperm.xlu0 %821, %v455_v48  }
  0x40   :  { %592 = vperm.xlu1 %822, %v458_v51   ;;  %587 = vperm.xlu0 %821, %v457_v52  }
  0x42   :  { %313 = vmatmul.mubr.bf16.gmra.mrb[16].mxu0 %v855_v49  ;;  %393 = vmatmul.mubr.bf16.gmra.mrb[16].mxu1 %v856_v50 }
  0x43   :  { %322 = vmatprep.mubr.bf16.mxu0 %v887_v2  ;;  %402 = vmatprep.mubr.bf16.mxu1 %v887_v2 }
  0x44   :  { %602 = vperm.xlu1 %822, %v460_v53   ;;  %597 = vperm.xlu0 %821, %v459_v54  }
  0x48   :  { %612 = vperm.xlu1 %822, %v462_v57   ;;  %607 = vperm.xlu0 %821, %v461_v58  }
  0x4a   :  { %323 = vmatmul.mubr.bf16.gmra.mrb[20].mxu0 %v857_v55  ;;  %403 = vmatmul.mubr.bf16.gmra.mrb[20].mxu1 %v858_v56 }
  0x4b   :  { %332 = vmatprep.mubr.bf16.mxu0 %v887_v2  ;;  %412 = vmatprep.mubr.bf16.mxu1 %v887_v2 }
  0x4c   :  { %622 = vperm.xlu1 %822, %v464_v59   ;;  %617 = vperm.xlu0 %821, %v463_v60  }
  0x52   :  { %333 = vmatmul.mubr.bf16.gmra.mrb[24].mxu0 %v859_v61  ;;  %413 = vmatmul.mubr.bf16.gmra.mrb[24].mxu1 %v860_v62 }
  0x53   :  { %342 = vmatprep.mubr.bf16.mxu0 %v887_v2  ;;  %422 = vmatprep.mubr.bf16.mxu1 %v887_v2 }
  0x5a   :  { %343 = vmatmul.mubr.bf16.gmra.mrb[28].mxu0 %v861_v63  ;;  %423 = vmatmul.mubr.bf16.gmra.mrb[28].mxu1 %v862_v0 }
  0x85   :  { %v478_v1 = vpop.permute.xlu1 %477  ;;  %v468_v3 = vpop.permute.xlu0 %467 }
  0x89   :  { %v483_v4 = vpop.permute.xlu1 %482  ;;  %v473_v5 = vpop.permute.xlu0 %472 }
  0x8d   :  { %v1121_v6 = vpop.permute.xlu1 %492  ;;  %v1123_v7 = vpop.permute.xlu0 %487 }
  0x91   :  { %v1125_v8 = vpop.permute.xlu1 %502  ;;  %v1127_v2 = vpop.permute.xlu0 %497 }
  0x95   :  { %v1129_v9 = vpop.permute.xlu1 %512  ;;  %v1131_v10 = vpop.permute.xlu0 %507 }
  0x99   :  { %v1133_v11 = vpop.permute.xlu1 %522 }
  0xa3   :  { %v1135_v12 = vpop.permute.xlu0 %517 }
  0xa6   :  { %v1137_v13 = vpop.permute.xlu1 %532 }
  0xa7   :  { %v1139_v14 = vpop.permute.xlu0 %527 }
  0xab   :  { %v1141_v15 = vpop.permute.xlu1 %542  ;;  %v1143_v16 = vpop.permute.xlu0 %537 }
  0xaf   :  { %v553_v17 = vpop.permute.xlu1 %552  ;;  %v548_v18 = vpop.permute.xlu0 %547 }
  0xb3   :  { %v563_v35 = vpop.permute.xlu1 %562  ;;  %v558_v36 = vpop.permute.xlu0 %557 }
  0xb7   :  { %v573_v53 = vpop.permute.xlu1 %572  ;;  %v568_v54 = vpop.permute.xlu0 %567 }
  0xf5   :  { %v274_v19 = vpop.f32.mrb[0].mxu0  ;;  %v354_v20 = vpop.f32.mrb[0].mxu1 }
  0xf6   :  { %v625_v21 = vmul.f32 %v468_v3, %v274_v19  ;;  %v657_v22 = vmul.f32 %v548_v18, %v354_v20  ;;  %v276_v23 = vpop.f32.mrb[1].mxu0  ;;  %v356_v24 = vpop.f32.mrb[1].mxu1 }
  0xf7   :  { %v626_v25 = vmul.f32 %v468_v3, %v276_v23  ;;  %v658_v26 = vmul.f32 %v548_v18, %v356_v24  ;;  %v278_v27 = vpop.f32.mrb[2].mxu0  ;;  %v358_v28 = vpop.f32.mrb[2].mxu1 }
  0xf8   :  { %689 = vst [vmem:[#allocation2] sm:$0xff] %v625_v21  ;;  %721 = vst [vmem:[#allocation2 + $0x100] sm:$0xff] %v657_v22  ;;  %v627_v29 = vmul.f32 %v473_v5, %v278_v27  ;;  %v659_v30 = vmul.f32 %v553_v17, %v358_v28  ;;  %v280_v31 = vpop.f32.mrb[3].mxu0  ;;  %v360_v32 = vpop.f32.mrb[3].mxu1 }
  0xf9   :  { %690 = vst [vmem:[#allocation2 + $0x8] sm:$0xff] %v626_v25  ;;  %722 = vst [vmem:[#allocation2 + $0x108] sm:$0xff] %v658_v26  ;;  %v628_v33 = vmul.f32 %v473_v5, %v280_v31  ;;  %v660_v34 = vmul.f32 %v553_v17, %v360_v32  ;;  %v578_v19 = vpop.permute.xlu0 %577 }
  0xfa   :  { %691 = vst [vmem:[#allocation2 + $0x10] sm:$0xff] %v627_v29  ;;  %723 = vst [vmem:[#allocation2 + $0x110] sm:$0xff] %v659_v30 }
  0xfb   :  { %692 = vst [vmem:[#allocation2 + $0x18] sm:$0xff] %v628_v33  ;;  %724 = vst [vmem:[#allocation2 + $0x118] sm:$0xff] %v660_v34 }
  0xfd   :  { %v284_v37 = vpop.f32.mrb[4].mxu0  ;;  %v364_v38 = vpop.f32.mrb[4].mxu1 }
  0xfe   :  { %v629_v39 = vmul.f32 %v478_v1, %v284_v37  ;;  %v661_v40 = vmul.f32 %v558_v36, %v364_v38  ;;  %v286_v41 = vpop.f32.mrb[5].mxu0  ;;  %v366_v42 = vpop.f32.mrb[5].mxu1 }
  0xff   :  { %v630_v43 = vmul.f32 %v478_v1, %v286_v41  ;;  %v662_v44 = vmul.f32 %v558_v36, %v366_v42  ;;  %v288_v45 = vpop.f32.mrb[6].mxu0  ;;  %v368_v46 = vpop.f32.mrb[6].mxu1 }
 0x100   :  { %693 = vst [vmem:[#allocation2 + $0x20] sm:$0xff] %v629_v39  ;;  %725 = vst [vmem:[#allocation2 + $0x120] sm:$0xff] %v661_v40  ;;  %v631_v47 = vmul.f32 %v483_v4, %v288_v45  ;;  %v663_v48 = vmul.f32 %v563_v35, %v368_v46  ;;  %v290_v49 = vpop.f32.mrb[7].mxu0  ;;  %v370_v50 = vpop.f32.mrb[7].mxu1 }
 0x101   :  { %694 = vst [vmem:[#allocation2 + $0x28] sm:$0xff] %v630_v43  ;;  %726 = vst [vmem:[#allocation2 + $0x128] sm:$0xff] %v662_v44  ;;  %v632_v51 = vmul.f32 %v483_v4, %v290_v49  ;;  %v664_v52 = vmul.f32 %v563_v35, %v370_v50  ;;  %v588_v35 = vpop.permute.xlu0 %587 }
 0x102   :  { %695 = vst [vmem:[#allocation2 + $0x30] sm:$0xff] %v631_v47  ;;  %727 = vst [vmem:[#allocation2 + $0x130] sm:$0xff] %v663_v48 }
 0x103   :  { %696 = vst [vmem:[#allocation2 + $0x38] sm:$0xff] %v632_v51  ;;  %728 = vst [vmem:[#allocation2 + $0x138] sm:$0xff] %v664_v52 }
 0x105   :  { %v294_v55 = vpop.f32.mrb[8].mxu0  ;;  %v374_v56 = vpop.f32.mrb[8].mxu1 }
 0x106   :  { %v633_v57 = vmul.f32 %v1123_v7, %v294_v55  ;;  %v665_v58 = vmul.f32 %v568_v54, %v374_v56  ;;  %v296_v59 = vpop.f32.mrb[9].mxu0  ;;  %v376_v60 = vpop.f32.mrb[9].mxu1 }
 0x107   :  { %v634_v61 = vmul.f32 %v1123_v7, %v296_v59  ;;  %v666_v62 = vmul.f32 %v568_v54, %v376_v60  ;;  %v298_v63 = vpop.f32.mrb[10].mxu0  ;;  %v378_v0 = vpop.f32.mrb[10].mxu1 }
 0x108   :  { %697 = vst [vmem:[#allocation2 + $0x40] sm:$0xff] %v633_v57  ;;  %729 = vst [vmem:[#allocation2 + $0x140] sm:$0xff] %v665_v58  ;;  %v635_v1 = vmul.f32 %v1121_v6, %v298_v63  ;;  %v667_v3 = vmul.f32 %v573_v53, %v378_v0  ;;  %v300_v4 = vpop.f32.mrb[11].mxu0  ;;  %v380_v5 = vpop.f32.mrb[11].mxu1 }
 0x109   :  { %698 = vst [vmem:[#allocation2 + $0x48] sm:$0xff] %v634_v61  ;;  %730 = vst [vmem:[#allocation2 + $0x148] sm:$0xff] %v666_v62  ;;  %v636_v17 = vmul.f32 %v1121_v6, %v300_v4  ;;  %v668_v18 = vmul.f32 %v573_v53, %v380_v5  ;;  %v583_v7 = vpop.permute.xlu1 %582  ;;  %v598_v51 = vpop.permute.xlu0 %597 }
 0x10a   :  { %699 = vst [vmem:[#allocation2 + $0x50] sm:$0xff] %v635_v1  ;;  %731 = vst [vmem:[#allocation2 + $0x150] sm:$0xff] %v667_v3 }
 0x10b   :  { %700 = vst [vmem:[#allocation2 + $0x58] sm:$0xff] %v636_v17  ;;  %732 = vst [vmem:[#allocation2 + $0x158] sm:$0xff] %v668_v18 }
 0x10d   :  { %v304_v20 = vpop.f32.mrb[12].mxu0  ;;  %v384_v21 = vpop.f32.mrb[12].mxu1 }
 0x10e   :  { %v637_v22 = vmul.f32 %v1127_v2, %v304_v20  ;;  %v669_v23 = vmul.f32 %v578_v19, %v384_v21  ;;  %v306_v24 = vpop.f32.mrb[13].mxu0  ;;  %v386_v25 = vpop.f32.mrb[13].mxu1 }
 0x10f   :  { %v638_v26 = vmul.f32 %v1127_v2, %v306_v24  ;;  %v670_v27 = vmul.f32 %v578_v19, %v386_v25  ;;  %v308_v28 = vpop.f32.mrb[14].mxu0  ;;  %v388_v29 = vpop.f32.mrb[14].mxu1 }
 0x110   :  { %701 = vst [vmem:[#allocation2 + $0x60] sm:$0xff] %v637_v22  ;;  %733 = vst [vmem:[#allocation2 + $0x160] sm:$0xff] %v669_v23  ;;  %v639_v6 = vmul.f32 %v1125_v8, %v308_v28  ;;  %v671_v30 = vmul.f32 %v583_v7, %v388_v29  ;;  %v310_v31 = vpop.f32.mrb[15].mxu0  ;;  %v390_v32 = vpop.f32.mrb[15].mxu1 }
 0x111   :  { %702 = vst [vmem:[#allocation2 + $0x68] sm:$0xff] %v638_v26  ;;  %734 = vst [vmem:[#allocation2 + $0x168] sm:$0xff] %v670_v27  ;;  %v640_v33 = vmul.f32 %v1125_v8, %v310_v31  ;;  %v672_v34 = vmul.f32 %v583_v7, %v390_v32  ;;  %v593_v2 = vpop.permute.xlu1 %592  ;;  %v608_v4 = vpop.permute.xlu0 %607 }
 0x112   :  { %703 = vst [vmem:[#allocation2 + $0x70] sm:$0xff] %v639_v6  ;;  %735 = vst [vmem:[#allocation2 + $0x170] sm:$0xff] %v671_v30 }
 0x113   :  { %704 = vst [vmem:[#allocation2 + $0x78] sm:$0xff] %v640_v33  ;;  %736 = vst [vmem:[#allocation2 + $0x178] sm:$0xff] %v672_v34 }
 0x115   :  { %v314_v36 = vpop.f32.mrb[16].mxu0  ;;  %v394_v37 = vpop.f32.mrb[16].mxu1 }
 0x116   :  { %v641_v38 = vmul.f32 %v1131_v10, %v314_v36  ;;  %v673_v39 = vmul.f32 %v588_v35, %v394_v37  ;;  %v316_v40 = vpop.f32.mrb[17].mxu0  ;;  %v396_v41 = vpop.f32.mrb[17].mxu1 }
 0x117   :  { %v642_v42 = vmul.f32 %v1131_v10, %v316_v40  ;;  %v674_v43 = vmul.f32 %v588_v35, %v396_v41  ;;  %v318_v44 = vpop.f32.mrb[18].mxu0  ;;  %v398_v45 = vpop.f32.mrb[18].mxu1 }
 0x118   :  { %705 = vst [vmem:[#allocation2 + $0x80] sm:$0xff] %v641_v38  ;;  %737 = vst [vmem:[#allocation2 + $0x180] sm:$0xff] %v673_v39  ;;  %v643_v8 = vmul.f32 %v1129_v9, %v318_v44  ;;  %v675_v46 = vmul.f32 %v593_v2, %v398_v45  ;;  %v320_v47 = vpop.f32.mrb[19].mxu0  ;;  %v400_v48 = vpop.f32.mrb[19].mxu1 }
 0x119   :  { %706 = vst [vmem:[#allocation2 + $0x88] sm:$0xff] %v642_v42  ;;  %738 = vst [vmem:[#allocation2 + $0x188] sm:$0xff] %v674_v43  ;;  %v644_v49 = vmul.f32 %v1129_v9, %v320_v47  ;;  %v676_v50 = vmul.f32 %v593_v2, %v400_v48  ;;  %v603_v10 = vpop.permute.xlu1 %602  ;;  %v618_v6 = vpop.permute.xlu0 %617 }
 0x11a   :  { %707 = vst [vmem:[#allocation2 + $0x90] sm:$0xff] %v643_v8  ;;  %739 = vst [vmem:[#allocation2 + $0x190] sm:$0xff] %v675_v46 }
 0x11b   :  { %708 = vst [vmem:[#allocation2 + $0x98] sm:$0xff] %v644_v49  ;;  %740 = vst [vmem:[#allocation2 + $0x198] sm:$0xff] %v676_v50 }
 0x11d   :  { %v324_v52 = vpop.f32.mrb[20].mxu0  ;;  %v404_v53 = vpop.f32.mrb[20].mxu1 }
 0x11e   :  { %v645_v54 = vmul.f32 %v1135_v12, %v324_v52  ;;  %v677_v55 = vmul.f32 %v598_v51, %v404_v53  ;;  %v326_v56 = vpop.f32.mrb[21].mxu0  ;;  %v406_v57 = vpop.f32.mrb[21].mxu1 }
 0x11f   :  { %v646_v58 = vmul.f32 %v1135_v12, %v326_v56  ;;  %v678_v59 = vmul.f32 %v598_v51, %v406_v57  ;;  %v328_v60 = vpop.f32.mrb[22].mxu0  ;;  %v408_v61 = vpop.f32.mrb[22].mxu1 }
 0x120   :  { %709 = vst [vmem:[#allocation2 + $0xa0] sm:$0xff] %v645_v54  ;;  %741 = vst [vmem:[#allocation2 + $0x1a0] sm:$0xff] %v677_v55  ;;  %v647_v9 = vmul.f32 %v1133_v11, %v328_v60  ;;  %v679_v62 = vmul.f32 %v603_v10, %v408_v61  ;;  %v330_v63 = vpop.f32.mrb[23].mxu0  ;;  %v410_v0 = vpop.f32.mrb[23].mxu1 }
 0x121   :  { %710 = vst [vmem:[#allocation2 + $0xa8] sm:$0xff] %v646_v58  ;;  %742 = vst [vmem:[#allocation2 + $0x1a8] sm:$0xff] %v678_v59  ;;  %v648_v1 = vmul.f32 %v1133_v11, %v330_v63  ;;  %v680_v3 = vmul.f32 %v603_v10, %v410_v0  ;;  %v613_v12 = vpop.permute.xlu1 %612 }
 0x122   :  { %711 = vst [vmem:[#allocation2 + $0xb0] sm:$0xff] %v647_v9  ;;  %743 = vst [vmem:[#allocation2 + $0x1b0] sm:$0xff] %v679_v62 }
 0x123   :  { %712 = vst [vmem:[#allocation2 + $0xb8] sm:$0xff] %v648_v1  ;;  %744 = vst [vmem:[#allocation2 + $0x1b8] sm:$0xff] %v680_v3 }
 0x125   :  { %v334_v5 = vpop.f32.mrb[24].mxu0  ;;  %v414_v17 = vpop.f32.mrb[24].mxu1 }
 0x126   :  { %v649_v18 = vmul.f32 %v1139_v14, %v334_v5  ;;  %v681_v7 = vmul.f32 %v608_v4, %v414_v17  ;;  %v336_v19 = vpop.f32.mrb[25].mxu0  ;;  %v416_v20 = vpop.f32.mrb[25].mxu1 }
 0x127   :  { %v650_v21 = vmul.f32 %v1139_v14, %v336_v19  ;;  %v682_v22 = vmul.f32 %v608_v4, %v416_v20  ;;  %v338_v23 = vpop.f32.mrb[26].mxu0  ;;  %v418_v24 = vpop.f32.mrb[26].mxu1 }
 0x128   :  { %713 = vst [vmem:[#allocation2 + $0xc0] sm:$0xff] %v649_v18  ;;  %745 = vst [vmem:[#allocation2 + $0x1c0] sm:$0xff] %v681_v7  ;;  %v651_v11 = vmul.f32 %v1137_v13, %v338_v23  ;;  %v683_v25 = vmul.f32 %v613_v12, %v418_v24  ;;  %v340_v26 = vpop.f32.mrb[27].mxu0  ;;  %v420_v27 = vpop.f32.mrb[27].mxu1 }
 0x129   :  { %714 = vst [vmem:[#allocation2 + $0xc8] sm:$0xff] %v650_v21  ;;  %746 = vst [vmem:[#allocation2 + $0x1c8] sm:$0xff] %v682_v22  ;;  %v652_v28 = vmul.f32 %v1137_v13, %v340_v26  ;;  %v684_v29 = vmul.f32 %v613_v12, %v420_v27  ;;  %v623_v14 = vpop.permute.xlu1 %622 }
 0x12a   :  { %715 = vst [vmem:[#allocation2 + $0xd0] sm:$0xff] %v651_v11  ;;  %747 = vst [vmem:[#allocation2 + $0x1d0] sm:$0xff] %v683_v25 }
 0x12b   :  { %716 = vst [vmem:[#allocation2 + $0xd8] sm:$0xff] %v652_v28  ;;  %748 = vst [vmem:[#allocation2 + $0x1d8] sm:$0xff] %v684_v29 }
 0x12d   :  { %v344_v30 = vpop.f32.mrb[28].mxu0  ;;  %v424_v31 = vpop.f32.mrb[28].mxu1 }
 0x12e   :  { %v653_v32 = vmul.f32 %v1143_v16, %v344_v30  ;;  %v685_v33 = vmul.f32 %v618_v6, %v424_v31  ;;  %v346_v34 = vpop.f32.mrb[29].mxu0  ;;  %v426_v2 = vpop.f32.mrb[29].mxu1 }
 0x12f   :  { %v654_v35 = vmul.f32 %v1143_v16, %v346_v34  ;;  %v686_v36 = vmul.f32 %v618_v6, %v426_v2  ;;  %v348_v13 = vpop.f32.mrb[30].mxu0  ;;  %v428_v37 = vpop.f32.mrb[30].mxu1 }
 0x130   :  { %717 = vst [vmem:[#allocation2 + $0xe0] sm:$0xff] %v653_v32  ;;  %749 = vst [vmem:[#allocation2 + $0x1e0] sm:$0xff] %v685_v33  ;;  %v655_v38 = vmul.f32 %v1141_v15, %v348_v13  ;;  %v687_v39 = vmul.f32 %v623_v14, %v428_v37  ;;  %v350_v40 = vpop.f32.mrb[31].mxu0  ;;  %v430_v41 = vpop.f32.mrb[31].mxu1 }
 0x131   :  { %718 = vst [vmem:[#allocation2 + $0xe8] sm:$0xff] %v654_v35  ;;  %750 = vst [vmem:[#allocation2 + $0x1e8] sm:$0xff] %v686_v36  ;;  %v656_v42 = vmul.f32 %v1141_v15, %v350_v40  ;;  %v688_v43 = vmul.f32 %v623_v14, %v430_v41 }
 0x132   :  { %719 = vst [vmem:[#allocation2 + $0xf0] sm:$0xff] %v655_v38  ;;  %751 = vst [vmem:[#allocation2 + $0x1f0] sm:$0xff] %v687_v39 }
 0x133   :  { %720 = vst [vmem:[#allocation2 + $0xf8] sm:$0xff] %v656_v42  ;;  %752 = vst [vmem:[#allocation2 + $0x1f8] sm:$0xff] %v688_v43 }
 0x134   :  { %874 = shalt.err (!%p871_p4)
}
 0x135   :  { %s875_s5 = scalar_lea.hbm %s1184_s3, 8192 }
 0x136   :  { %p876_p5 = scmp.ne.s32.totalorder %s1184_s3, %s875_s5  ;;  %p879_p6 = scmp.lt.u32.totalorder %s875_s5, %s1184_s3 }
 0x138   :  { %p881_p7 = pnand %p879_p6, %p876_p5 }
 0x13a   :  { %884 = shalt.err (!%p881_p7)
}
 0x13b   :  { %s889_s9 = smov 256   ;;  %s890_s10 = smov 16  }
 0x13c   :  { %764 = dma.vmem_to_hbm [thread:$0]  %s759_s28, 8192, %s1184_s3, [#allocation3], %s889_s9, %s889_s9, %s890_s10  }
 0x13d   :  { %885 = dma.done.wait [#allocation3], 8192  }
 0x13e   :  { %886 = vsyncadd [#allocation3], 4294959104 }
 0x13f   :  { %768 = vsyncpa [#allocation3], 1 }

</bundles_post_ra>
